<compile_context>
chip_gen: v5e
topology: v5e:2x2
jax: 0.10.0
libtpu: 0.0.40
codegen_flags: <defaults>
</compile_context>

<pallas_src>
import functools

import jax
import jax.numpy as jnp
from jax.experimental import pallas as pl
from jax.experimental.pallas import tpu as pltpu

_NEG_MASK = -1e32      # additive bias for masked positions (matches the PyTorch module)
_NEG_PAD = -1e30       # bias for the padded (fake) tag classes beyond num_tags


def _round_up(x, m):
    return (x + m - 1) // m * m


def _cdiv(a, b):
    return -(-a // b)


def _pick_tm(rows, block_rows):
    """Row-tile size: as large as block_rows, but never fewer than 2 tiles so the
    'parallel' grid axis can be split across v7x's two TensorCores."""
    half = _round_up(_cdiv(rows, 2), 8)
    return max(8, min(block_rows, half))


def _tagging_kernel(pad_ref, mask_ref, tags_ref, hid_ref, w_ref, b_ref,
                    prob_ref, part_ref):
    """One row-tile of the tagging head.

    hid_ref : (TM, H)   f32  encoder hidden states (all B*S rows; bf16 cast happens here)
    w_ref   : (H, Tp)   bf16 linear-head weight, T padded to Tp=128 lanes
    b_ref   : (1, Tp)   f32  linear-head bias (-1e30 on padded classes)
    mask_ref: (TM, 1)   f32  tag_mask (0 on [CLS]/[SEP]/padding rows)
    tags_ref: (TM, 1)   i32  tag ids (pad on [CLS]/[SEP]/padding rows)
    pad_ref : (1,)      i32  tag_pad_idx (scalar prefetch, SMEM)
    prob_ref: (TM, Tp)  f32  softmax probabilities (lane-dense store)
    part_ref: (1,8,128) f32  per-tile loss partials: sublane 0 = sum(nll), others = sum(valid)
    """
    tm = hid_ref.shape[0]
    tp = w_ref.shape[1]

    mask = mask_ref[...]                                   # (TM, 1) f32
    tags = tags_ref[...]                                   # (TM, 1) i32

    # MXU matmul with f32 accumulation; activations cast to bf16 in-register (no extra
    # HBM pass).  dropout == identity (eval mode).
    z = jnp.dot(hid_ref[...].astype(jnp.bfloat16), w_ref[...],
                preferred_element_type=jnp.float32)        # (TM, Tp) f32

    # tag_mask is {0,1}: masked rows collapse to the -1e32 bias.  This also neutralizes
    # garbage rows coming from the partial final hid tile (their mask is 0).
    logits = jnp.where(mask > 0, z, _NEG_MASK) + b_ref[...]

    # softmax(dim=-1); the (TM,1) reciprocal goes to the EUP slot.
    m = jnp.max(logits, axis=-1, keepdims=True)            # (TM, 1)
    e = jnp.exp(logits - m)
    s = jnp.sum(e, axis=-1, keepdims=True)                 # (TM, 1)
    prob_ref[...] = e * pl.reciprocal(s, approx=True)

    # CrossEntropy(ignore_index=pad_idx): nll = log(s) + m - logits[target]
    pad_idx = pad_ref[0]
    iota_t = jax.lax.broadcasted_iota(jnp.int32, (tm, tp), 1)
    onehot = (iota_t == tags).astype(jnp.float32)          # (TM, Tp)
    tgt_logit = jnp.sum(logits * onehot, axis=-1, keepdims=True)
    valid = (tags != pad_idx).astype(jnp.float32)          # (TM, 1)
    nll = (jnp.log(s) + m - tgt_logit) * valid

    # Per-tile scalar partials packed into one lane-dense vreg (no per-row masked stores).
    sub = jax.lax.broadcasted_iota(jnp.int32, part_ref.shape, 1)
    part_ref[...] = jnp.where(sub == 0, jnp.sum(nll), jnp.sum(valid))


def prepare_head_params(w, b):
    """Pad the TaggingFNNDecoder weight/bias to a lane-dense 128-wide class dim.
    Called ONCE per model (hoisted out of the per-call path)."""
    H, T = w.shape
    tp = max(128, _round_up(T, 128))
    w_p = jnp.zeros((H, tp), jnp.float32).at[:, :T].set(w).astype(jnp.bfloat16)
    b_p = jnp.full((1, tp), _NEG_PAD, jnp.float32).at[:, :T].set(jnp.reshape(b, (1, T)))
    return w_p, b_p


@functools.partial(jax.jit, static_argnames=("num_tags", "block_rows"))
def electra_tagging_head(hid, tag_mask, tag_ids, w_p, b_p, tag_pad_idx, *,
                         num_tags, block_rows=1024):
    """hid: (B, S, H) f32 encoder last_hidden_state (S includes [CLS]/[SEP]),
       tag_mask: (B, S-2) f32, tag_ids: (B, S-2) i32,
       w_p/b_p: padded head params from prepare_head_params
       -> (prob (B, S-2, num_tags) f32, loss scalar f32)."""
    B, S, H = hid.shape
    T = num_tags
    tp = w_p.shape[1]
    rows = B * S

    # Stream the encoder output untouched: reshape is a free view, no slice / cast pass.
    hid2 = hid.reshape(rows, H)

    tm = _pick_tm(rows, block_rows)
    num_tiles = _cdiv(rows, tm)
    rows_p = num_tiles * tm

    # Tiny mask/tag streams carry the [CLS]/[SEP] strip (mask=0, tag=pad on those rows)
    # and are padded to the tile multiple, so the partial final hid/prob tile can never
    # contribute garbage to the loss.
    tag_pad = jnp.asarray(tag_pad_idx, jnp.int32)
    mask_bs = jnp.zeros((B, S), jnp.float32).at[:, 1:S - 1].set(tag_mask.astype(jnp.float32))
    tags_bs = jnp.full((B, S), tag_pad, jnp.int32).at[:, 1:S - 1].set(tag_ids.astype(jnp.int32))
    mask2 = jnp.zeros((rows_p, 1), jnp.float32).at[:rows, :].set(mask_bs.reshape(rows, 1))
    tags2 = jnp.full((rows_p, 1), tag_pad, jnp.int32).at[:rows, :].set(tags_bs.reshape(rows, 1))

    pad_arr = tag_pad.reshape(1)

    prob_p, part = pl.pallas_call(
        _tagging_kernel,
        out_shape=(jax.ShapeDtypeStruct((rows, tp), jnp.float32),
                   jax.ShapeDtypeStruct((num_tiles, 8, 128), jnp.float32)),
        grid_spec=pltpu.PrefetchScalarGridSpec(
            num_scalar_prefetch=1,
            grid=(num_tiles,),
            in_specs=[
                pl.BlockSpec((tm, 1), lambda i, p: (i, 0)),      # tag_mask row tile
                pl.BlockSpec((tm, 1), lambda i, p: (i, 0)),      # tag_ids row tile
                pl.BlockSpec((tm, H), lambda i, p: (i, 0)),      # hidden states (f32)
                pl.BlockSpec((H, tp), lambda i, p: (0, 0)),      # W (bf16), resident
                pl.BlockSpec((1, tp), lambda i, p: (0, 0)),      # b (f32), resident
            ],
            out_specs=(
                pl.BlockSpec((tm, tp), lambda i, p: (i, 0)),         # prob (lane-dense)
                pl.BlockSpec((1, 8, 128), lambda i, p: (i, 0, 0)),   # per-tile loss partials
            ),
        ),
        compiler_params=pltpu.CompilerParams(
            dimension_semantics=("parallel",),
            vmem_limit_bytes=32 * 1024 * 1024,
        ),
    )(pad_arr, mask2, tags2, hid2, w_p, b_p)

    # [CLS]/[SEP] + lane-pad strip: one fused slice of the kernel output.
    prob = prob_p.reshape(B, S, tp)[:, 1:S - 1, :T]
    nll_total = jnp.sum(part[:, 0, 0])
    valid_total = jnp.sum(part[:, 1, 0])
    # Mean over non-ignored targets.  NOTE: like the PyTorch reference, this is NaN if
    # every tag equals tag_pad_idx (valid_total == 0).
    loss = nll_total / valid_total
    return prob, loss


if __name__ == "__main__":
    key = jax.random.PRNGKey(0)
    B, L, H, T, V = 2, 8, 32, 16, 64    # batch, seq (w/o CLS/SEP), hidden, num_tags, vocab
    S = L + 2                           # encoder sequence includes [CLS]/[SEP]
    tag_pad_idx = 0

    k1, k2, k3, k4, k5 = jax.random.split(key, 5)

    # TODO(synk): the pretrained ELECTRA encoder (AutoModel) + tokenizer/regex pipeline
    # cannot be reproduced in-script; last_hidden_state is synthesized via a
    # deterministic embedding lookup.
    input_ids = jax.random.randint(k1, (B, S), 0, V)
    emb_table = jax.random.normal(k2, (V, H), jnp.float32) * 0.1
    hid = emb_table[input_ids]                              # (B, S, H)

    lengths = jnp.array([L, L - 3], jnp.int32)
    pos = jnp.arange(L)[None, :]
    tag_mask = (pos < lengths[:, None]).astype(jnp.float32)        # (B, L)
    tag_ids = jax.random.randint(k3, (B, L), 1, T)
    tag_ids = jnp.where(tag_mask > 0, tag_ids, tag_pad_idx).astype(jnp.int32)

    # TaggingFNNDecoder parameters (nn.Linear(hidden_size, num_tags)), deterministic init.
    w = jax.random.normal(k4, (H, T), jnp.float32) * 0.05
    b = jax.random.normal(k5, (1, T), jnp.float32) * 0.05

    # Head parameters are padded / cast once per model, outside the per-call path.
    w_p, b_p = prepare_head_params(w, b)

    prob, loss = electra_tagging_head(hid, tag_mask, tag_ids, w_p, b_p, tag_pad_idx,
                                      num_tags=T)
    jax.block_until_ready((prob, loss))

    # Pure-JAX reference with the same bf16 matmul operands as the kernel.
    hid_bf = hid.astype(jnp.bfloat16).astype(jnp.float32)
    w_bf = w.astype(jnp.bfloat16).astype(jnp.float32)
    ref_out = hid_bf[:, 1:-1, :] * tag_mask[..., None]
    ref_logits = ref_out @ w_bf + b
    ref_logits = ref_logits + (1.0 - tag_mask)[..., None] * (-1e32)
    ref_prob = jax.nn.softmax(ref_logits, axis=-1)
    ref_logp = jax.nn.log_softmax(ref_logits, axis=-1)
    ref_nll = -jnp.take_along_axis(ref_logp, tag_ids[..., None], axis=-1)[..., 0]
    valid = (tag_ids != tag_pad_idx).astype(jnp.float32)
    ref_loss = jnp.sum(ref_nll * valid) / jnp.sum(valid)

    assert prob.shape == (B, L, T)
    assert bool(jnp.all(jnp.isfinite(prob))), "prob not finite"
    assert jnp.allclose(prob, ref_prob, atol=2e-3), "prob mismatch"
    assert jnp.allclose(loss, ref_loss, atol=2e-3, rtol=2e-3), "loss mismatch"
    print("KERNEL_OK")
</pallas_src>

<mosaic_0001>
module attributes {stable_mosaic.version = 11 : i64} {
  func.func @_tagging_kernel(%arg0: i32, %arg1: memref<1xi32, #tpu.memory_space<smem>>, %arg2: memref<16x1xf32, #tpu.memory_space<vmem>>, %arg3: memref<16x1xi32, #tpu.memory_space<vmem>>, %arg4: memref<16x32xf32, #tpu.memory_space<vmem>>, %arg5: memref<32x128xbf16, #tpu.memory_space<vmem>>, %arg6: memref<1x128xf32, #tpu.memory_space<vmem>>, %arg7: memref<16x128xf32, #tpu.memory_space<vmem>>, %arg8: memref<1x8x128xf32, #tpu.memory_space<vmem>>) attributes {dimension_semantics = [#tpu.dimension_semantics<parallel>], iteration_bounds = array<i64: 2>, scalar_prefetch = 1 : i64, scratch_operands = 0 : i64, tpu.core_type = #tpu.core_type<tc>, window_params = [{transform_indices = @transform_0, window_bounds = array<i64: 16, 1>}, {transform_indices = @transform_1, window_bounds = array<i64: 16, 1>}, {transform_indices = @transform_2, window_bounds = array<i64: 16, 32>}, {pipeline_mode = #tpu.pipeline_mode<synchronous>, transform_indices = @transform_3, window_bounds = array<i64: 32, 128>}, {pipeline_mode = #tpu.pipeline_mode<synchronous>, transform_indices = @transform_4, window_bounds = array<i64: 1, 128>}, {transform_indices = @transform_5, window_bounds = array<i64: 16, 128>}, {transform_indices = @transform_6, window_bounds = array<i64: 1, 8, 128>}]} {
    %c0 = arith.constant 0 : index
    %c0_0 = arith.constant 0 : index
    %0 = vector.load %arg2[%c0, %c0_0] : memref<16x1xf32, #tpu.memory_space<vmem>>, vector<16x1xf32>
    %c0_1 = arith.constant 0 : index
    %c0_2 = arith.constant 0 : index
    %1 = vector.load %arg3[%c0_1, %c0_2] : memref<16x1xi32, #tpu.memory_space<vmem>>, vector<16x1xi32>
    %c0_3 = arith.constant 0 : index
    %c0_4 = arith.constant 0 : index
    %2 = vector.load %arg4[%c0_3, %c0_4] : memref<16x32xf32, #tpu.memory_space<vmem>>, vector<16x32xf32>
    %3 = arith.truncf %2 : vector<16x32xf32> to vector<16x32xbf16>
    %c0_5 = arith.constant 0 : index
    %c0_6 = arith.constant 0 : index
    %4 = vector.load %arg5[%c0_5, %c0_6] : memref<32x128xbf16, #tpu.memory_space<vmem>>, vector<32x128xbf16>
    %cst = arith.constant dense<0.000000e+00> : vector<16x128xf32>
    %5 = tpu.matmul %3, %4, %cst {dimension_numbers = #tpu.dot_dimension_numbers<[1], [0], [0], [1], [0, 0, 1, 1], [], []>} : vector<16x32xbf16>, vector<32x128xbf16>, vector<16x128xf32> -> vector<16x128xf32>
    %cst_7 = arith.constant 0.000000e+00 : f32
    %6 = vector.broadcast %cst_7 : f32 to vector<16x1xf32>
    %7 = arith.cmpf ogt, %0, %6 : vector<16x1xf32>
    %cst_8 = arith.constant -1.000000e+32 : f32
    %8 = vector.shape_cast %7 : vector<16x1xi1> to vector<16x1xi1>
    %9 = vector.broadcast %8 : vector<16x1xi1> to vector<16x128xi1>
    %10 = vector.broadcast %cst_8 : f32 to vector<16x128xf32>
    %11 = arith.select %9, %5, %10 : vector<16x128xi1>, vector<16x128xf32>
    %c0_9 = arith.constant 0 : index
    %c0_10 = arith.constant 0 : index
    %12 = vector.load %arg6[%c0_9, %c0_10] : memref<1x128xf32, #tpu.memory_space<vmem>>, vector<1x128xf32>
    %13 = vector.broadcast %12 : vector<1x128xf32> to vector<16x128xf32>
    %14 = arith.addf %11, %13 : vector<16x128xf32>
    %cst_11 = arith.constant dense<0xFF800000> : vector<16xf32>
    %15 = vector.multi_reduction <maximumf>, %14, %cst_11 [1] : vector<16x128xf32> to vector<16xf32>
    %16 = vector.shape_cast %15 : vector<16xf32> to vector<16x1xf32>
    %17 = vector.broadcast %16 : vector<16x1xf32> to vector<16x128xf32>
    %18 = arith.subf %14, %17 : vector<16x128xf32>
    %19 = math.exp %18 : vector<16x128xf32>
    %cst_12 = arith.constant dense<0.000000e+00> : vector<16xf32>
    %20 = vector.multi_reduction <add>, %19, %cst_12 [1] : vector<16x128xf32> to vector<16xf32>
    %21 = vector.shape_cast %20 : vector<16xf32> to vector<16x1xf32>
    %22 = tpu.reciprocal %21 {approx = true} : vector<16x1xf32> -> vector<16x1xf32>
    %23 = vector.broadcast %22 : vector<16x1xf32> to vector<16x128xf32>
    %24 = arith.mulf %19, %23 : vector<16x128xf32>
    %c0_13 = arith.constant 0 : index
    %c0_14 = arith.constant 0 : index
    %25 = vector.load %arg7[%c0_13, %c0_14] : memref<16x128xf32, #tpu.memory_space<vmem>>, vector<16x128xf32>
    tpu.vector_store %arg7[%c0_13, %c0_14], %24 {strides = array<i32>} : memref<16x128xf32, #tpu.memory_space<vmem>>, vector<16x128xf32>,
    %c0_15 = arith.constant 0 : index
    %26 = memref.load %arg1[%c0_15] : memref<1xi32, #tpu.memory_space<smem>>
    %27 = tpu.iota {dimensions = array<i32: 1>} : vector<16x128xi32>
    %28 = vector.broadcast %1 : vector<16x1xi32> to vector<16x128xi32>
    %29 = arith.cmpi eq, %27, %28 : vector<16x128xi32>
    %30 = arith.extui %29 : vector<16x128xi1> to vector<16x128xi32>
    %31 = arith.sitofp %30 : vector<16x128xi32> to vector<16x128xf32>
    %32 = arith.mulf %14, %31 : vector<16x128xf32>
    %cst_16 = arith.constant dense<0.000000e+00> : vector<16xf32>
    %33 = vector.multi_reduction <add>, %32, %cst_16 [1] : vector<16x128xf32> to vector<16xf32>
    %34 = vector.shape_cast %33 : vector<16xf32> to vector<16x1xf32>
    %35 = vector.broadcast %26 : i32 to vector<16x1xi32>
    %36 = arith.cmpi ne, %1, %35 : vector<16x1xi32>
    %37 = arith.extui %36 : vector<16x1xi1> to vector<16x1xi32>
    %38 = arith.sitofp %37 : vector<16x1xi32> to vector<16x1xf32>
    %39 = math.log %21 : vector<16x1xf32>
    %40 = arith.addf %39, %16 : vector<16x1xf32>
    %41 = arith.subf %40, %34 : vector<16x1xf32>
    %42 = arith.mulf %41, %38 : vector<16x1xf32>
    %43 = tpu.iota {dimensions = array<i32: 1>} : vector<1x8x128xi32>
    %c0_i32 = arith.constant 0 : i32
    %44 = vector.broadcast %c0_i32 : i32 to vector<1x8x128xi32>
    %45 = arith.cmpi eq, %43, %44 : vector<1x8x128xi32>
    %46 = vector.shape_cast %42 : vector<16x1xf32> to vector<1x16x1xf32>
    %cst_17 = arith.constant dense<0.000000e+00> : vector<1xf32>
    %47 = vector.multi_reduction <add>, %46, %cst_17 [1, 2] : vector<1x16x1xf32> to vector<1xf32>
    %48 = vector.shape_cast %47 : vector<1xf32> to vector<1x1x1xf32>
    %49 = vector.extract %48[0, 0, 0] : f32 from vector<1x1x1xf32>
    %50 = vector.shape_cast %38 : vector<16x1xf32> to vector<1x16x1xf32>
    %cst_18 = arith.constant dense<0.000000e+00> : vector<1xf32>
    %51 = vector.multi_reduction <add>, %50, %cst_18 [1, 2] : vector<1x16x1xf32> to vector<1xf32>
    %52 = vector.shape_cast %51 : vector<1xf32> to vector<1x1x1xf32>
    %53 = vector.extract %52[0, 0, 0] : f32 from vector<1x1x1xf32>
    %54 = vector.broadcast %49 : f32 to vector<1x8x128xf32>
    %55 = vector.broadcast %53 : f32 to vector<1x8x128xf32>
    %56 = arith.select %45, %54, %55 : vector<1x8x128xi1>, vector<1x8x128xf32>
    %c0_19 = arith.constant 0 : index
    %c0_20 = arith.constant 0 : index
    %c0_21 = arith.constant 0 : index
    %57 = vector.load %arg8[%c0_19, %c0_20, %c0_21] : memref<1x8x128xf32, #tpu.memory_space<vmem>>, vector<1x8x128xf32>
    tpu.vector_store %arg8[%c0_19, %c0_20, %c0_21], %56 {strides = array<i32>} : memref<1x8x128xf32, #tpu.memory_space<vmem>>, vector<1x8x128xf32>,
    return
  }
  func.func @transform_0(%arg0: i32, %arg1: memref<1xi32, #tpu.memory_space<smem>>) -> (i32, i32) {
    %c0_i32 = arith.constant 0 : i32
    %c0_i32_0 = arith.constant 0 : i32
    return %arg0, %c0_i32 : i32, i32
  }
  func.func @transform_1(%arg0: i32, %arg1: memref<1xi32, #tpu.memory_space<smem>>) -> (i32, i32) {
    %c0_i32 = arith.constant 0 : i32
    %c0_i32_0 = arith.constant 0 : i32
    return %arg0, %c0_i32 : i32, i32
  }
  func.func @transform_2(%arg0: i32, %arg1: memref<1xi32, #tpu.memory_space<smem>>) -> (i32, i32) {
    %c0_i32 = arith.constant 0 : i32
    %c0_i32_0 = arith.constant 0 : i32
    return %arg0, %c0_i32 : i32, i32
  }
  func.func @transform_3(%arg0: i32, %arg1: memref<1xi32, #tpu.memory_space<smem>>) -> (i32, i32) {
    %c0_i32 = arith.constant 0 : i32
    %c0_i32_0 = arith.constant 0 : i32
    %c0_i32_1 = arith.constant 0 : i32
    return %c0_i32, %c0_i32_0 : i32, i32
  }
  func.func @transform_4(%arg0: i32, %arg1: memref<1xi32, #tpu.memory_space<smem>>) -> (i32, i32) {
    %c0_i32 = arith.constant 0 : i32
    %c0_i32_0 = arith.constant 0 : i32
    %c0_i32_1 = arith.constant 0 : i32
    return %c0_i32, %c0_i32_0 : i32, i32
  }
  func.func @transform_5(%arg0: i32, %arg1: memref<1xi32, #tpu.memory_space<smem>>) -> (i32, i32) {
    %c0_i32 = arith.constant 0 : i32
    %c0_i32_0 = arith.constant 0 : i32
    return %arg0, %c0_i32 : i32, i32
  }
  func.func @transform_6(%arg0: i32, %arg1: memref<1xi32, #tpu.memory_space<smem>>) -> (i32, i32, i32) {
    %c0_i32 = arith.constant 0 : i32
    %c0_i32_0 = arith.constant 0 : i32
    %c0_i32_1 = arith.constant 0 : i32
    return %arg0, %c0_i32, %c0_i32_0 : i32, i32, i32
  }
}

</mosaic_0001>

<bundles_post_ra>
// kernel: electra_tagging_head.1
= control target key start
LH: loop header
LB: loop body
LE: loop exit
PB: predicated region body
PF: predicated region fallthrough
CT: control target
= control target key end

     0   :  { %s1157_s0 = inlined_call_operand.<no memory space> [shape: s32[1], index: 0, kind: input, shape index: {}]   ;;  %s1158_s1 = inlined_call_operand.vmem [shape: f32[32,1], index: 1, kind: input, shape index: {}]   ;;  %s1159_s2 = inlined_call_operand.vmem [shape: s32[32,1], index: 2, kind: input, shape index: {}]   ;;  %s1160_s3 = inlined_call_operand.vmem [shape: f32[20,32], index: 3, kind: input, shape index: {}]   ;;  %s1161_s4 = inlined_call_operand.vmem [shape: bf16[32,128], index: 4, kind: input, shape index: {}]   ;;  %s1162_s5 = inlined_call_operand.vmem [shape: f32[1,128], index: 5, kind: input, shape index: {}]   ;;  %s1163_s6 = inlined_call_operand.vmem [shape: f32[20,128], index: 6, kind: output, shape index: {0}]   ;;  %s1164_s7 = inlined_call_operand.vmem [shape: f32[2,8,128], index: 7, kind: output, shape index: {1}]  }
   0x1   :  { %13 = sst [smem:[#allocation3]] %s1157_s0 }
   0x2   :  { %s1046_s26 = smov 0   ;;  %s1048_s27 = smov 0  }
   0x3   :  { %s1050_s28 = smov 0  }
   0x4 LB: > { %s1059_s0 = sadd.s32 4294967295, %s967_s28   ;;  %s1061_s29 = sadd.s32 1, %s967_s28   ;;  %s967_s28 = sphi %s1050_s28, %s1168_s28   ;;  %s963_s27 = sphi %s1048_s27, %s1167_s27   ;;  %s959_s26 = sphi %s1046_s26, %s1166_s26  }
   0x5   : > { %s143_s30 = ssub.s32 %s967_s28, %s1061_s29  ;;  %s146_s8 = sadd.s32 1, %s963_s27 }
   0x6   : > { %p144_p0 = scmp.eq.s32.totalorder %s143_s30, 0  ;;  %p156_p1 = scmp.ne.s32.totalorder %s963_s27, %s959_s26 }
   0x7   : > { %p157_p2 = scmp.eq.s32.totalorder %s1059_s0, 1  ;;  %p760_p3 = scmp.ge.s32.totalorder %s967_s28, 1 }
   0x8   : > { %s1069_s9 = scalar_select %p144_p0, %s963_s27, %s146_s8  }
   0x9   : > { %p1071_p4 = por %p157_p2, %p156_p1  ;;  %p248_p5 = scmp.lt.s32.totalorder %s967_s28, 3 }
   0xb   : > { %p249_p6 = pnand %p760_p3, %p248_p5 }
   0xc   : > { %s1079_s13 = sshll.u32 (!%p249_p6), %s1059_s0, 1  ;;  %s412_s14 = sld [smem:[#allocation3]] (!%p249_p6) }
   0xd   : > { %252 = sbr.rel (%p249_p6) target bundleno = 654 (0x28e), region = 40  ;;  %p312_p7 = scmp.lt.s32.totalorder (!%p249_p6), %s1079_s13, 2 }
   0xe   : > { %p296_p8 = scmp.lt.s32.totalorder (!%p249_p6), %s1079_s13, 3  ;;  %s286_s15 = sand.u32 (!%p249_p6), 1, %s959_s26  }
   0xf   : > { %p326_p9 = scmp.lt.s32.totalorder (!%p249_p6), %s1059_s0, 1 }
  0x12   : > { %v800_v0 = vld [vmem:[%s1161_s4 + $0x8] sm:$0xff]  ;;  %v1001_v1 = vmov 0   ;;  %v799_v2 = vld [vmem:[%s1161_s4] sm:$0xff]  ;;  %s313_s16 = scalar_select %p312_p7, %s1079_s13, 2  ;;  %vm354_vm0 = vcmask 261120   ;;  %v413_v12 = vlaneseq  ;;  %v1002_v19 = vmov 0.0  }
  0x13   : > { %898 = vset.pattern.permute.xlu0 %v1001_v1  ;;  %899 = vset.pattern.permute.xlu2 %v1001_v1  ;;  %s297_s17 = scalar_select %p296_p8, %s1079_s13, 3  ;;  %v900_v16 = vld [vmem:[%s1162_s5] ss:$0 sm:$0xff]  ;;  %v433_v38 = vstv %s412_s14  ;;  %vm453_vm9 = vcmask 7168  }
  0x14   : > { %364 = vmatpush.bf16.msra.mxu0 %v800_v0  ;;  %s767_s18 = sshll.u32 %s313_s16, 3  ;;  %v414_v13 = vand.u32 127, %v413_v12  ;;  %s761_s16 = sshll.u32 %s286_s15, 4 }
  0x15   : > { %s315_s21 = scalar_lea.vmem %s1160_s3, %s767_s18  ;;  %s763_s22 = sshll.u32 %s297_s17, 3 }
  0x16   : > { %v335_v3 = vld [vmem:[%s315_s21] sm:$0xff]  ;;  %v336_v4 = vld [vmem:[%s315_s21 + $0x8] sm:$0xff]  ;;  %s299_s25 = scalar_lea.vmem %s1158_s1, %s763_s22  ;;  %s305_s8 = scalar_lea.vmem %s1159_s2, %s763_s22 }
  0x17   : > { %v337_v5 = vpack.c.bf16 %v336_v4, %v335_v3  ;;  %v331_v6 = vld [vmem:[%s299_s25] sm:$0xff]  ;;  %v332_v9 = vld [vmem:[%s299_s25 + $0x8] sm:$0xff]  ;;  %s1104_s17 = scalar_lea.vmem [#allocation4], %s761_s16   ;;  %s494_s24 = ssub.s32 (%p1071_p4), 3, %s1079_s13 }
  0x18   : > { %365 = vmatpush.bf16.msra.mxu0 %v799_v2  ;;  %v333_v7 = vld [vmem:[%s305_s8] sm:$0xff]  ;;  %vm372_vm1 = vcmp.gt.f32.partialorder %v331_v6, 0.0  ;;  %vm373_vm2 = vcmp.gt.f32.partialorder %v332_v9, 0.0  ;;  %v334_v10 = vld [vmem:[%s305_s8 + $0x8] sm:$0xff]  ;;  %s327_s26 = scalar_select %p326_p9, %s1059_s0, 1 }
  0x19   : > { %416 = vperm.xlu2 %899, %v333_v7   ;;  %v374_v8 = vsel %vm372_vm1, 1, %v1001_v1  ;;  %v375_v11 = vsel %vm373_vm2, 1, %v1001_v1  ;;  %vm434_vm7 = vcmp.ne.s32.totalorder %v333_v7, %v433_v38  ;;  %vm435_vm8 = vcmp.ne.s32.totalorder %v334_v10, %v433_v38  ;;  %s801_s25 = sshll.u32 (%p1071_p4), %s1059_s0, 4  ;;  %p495_p10 = scmp.lt.s32.totalorder (%p1071_p4), %s494_s24, 2 }
  0x1a   : > { %377 = vperm.xlu0 %898, %v374_v8   ;;  %v780_v39 = vsel %vm434_vm7, 1.0, %v1002_v19  ;;  %v781_v40 = vsel %vm435_vm8, 1.0, %v1002_v19  ;;  %s768_s18 = sshll.u32 %s327_s26, 3  ;;  %s1123_s8 = scalar_lea.vmem (%p1071_p4), %s1163_s6, %s801_s25  }
  0x1b   : > { %777 = vmatmul.msk.bf16.vlgmr.msra.gmra.mxu0 %vm354_vm0, %v337_v5  ;;  %v466_v41 = vsel %vm453_vm9, %v780_v39, 0.0  ;;  %v467_v42 = vsel %vm453_vm9, %v781_v40, 0.0  ;;  %s329_s22 = scalar_lea.vmem %s1164_s7, %s768_s18 }
  0x1c   : > { %v468_v43 = vadd.f32 %v467_v42, %v466_v41 }
  0x21   : > { %419 = vperm.xlu2 %899, %v334_v10  }
  0x22   : > { %380 = vperm.xlu0 %898, %v375_v11  }
  0x73   : > { %v417_v15 = vpop.permute.xlu2 %416 }
  0x74   : > { %vm421_vm4 = vcmp.eq.s32.totalorder %v414_v13, %v417_v15 }
  0x75   : > { %v778_v20 = vsel %vm421_vm4, 1.0, %v1002_v19 }
  0x7b   : > { %v420_v34 = vpop.permute.xlu2 %419 }
  0x7c   : > { %vm422_vm6 = vcmp.eq.s32.totalorder %v414_v13, %v420_v34 }
  0x7d   : > { %v779_v36 = vsel %vm422_vm6, 1.0, %v1002_v19 }
  0x8c   : > { %v378_v14 = vpop.permute.xlu0 %377 }
  0x8d   : > { %vm382_vm3 = vcmp.eq.s32.totalorder %v378_v14, 1 }
  0x94   : > { %v381_v23 = vpop.permute.xlu0 %380 }
  0x95   : > { %vm383_vm5 = vcmp.eq.s32.totalorder %v381_v23, 1 }
  0x98   : > { %v367_v17 = vpop.f32.mrf.mxu0 }
  0x99   : > { %v384_v18 = vsel %vm382_vm3, %v367_v17, -1e+32 }
  0x9a   : > { %v390_v21 = vadd.f32 %v900_v16, %v384_v18 }
  0x9c   : > { %392 = vmax.xlane.f32.xlu1 %v390_v21  ;;  %v427_v22 = vmul.f32 %v778_v20, %v390_v21 }
  0x9e   : > { %429 = vadd.xlane.f32.xlu2 %v427_v22 }
  0xa0   : > { %v369_v24 = vpop.f32.mrf.mxu0 }
  0xa1   : > { %v385_v25 = vsel %vm383_vm5, %v369_v24, -1e+32 }
  0xa2   : > { %v391_v26 = vadd.f32 %v900_v16, %v385_v25  ;;  %v451_v16 = vshrl.u32 %v413_v12, 7 }
  0xa4   : > { %394 = vmax.xlane.f32.xlu1 %v391_v26  ;;  %v428_v37 = vmul.f32 %v779_v36, %v391_v26  ;;  %vm452_vm10 = vcmp.eq.s32.totalorder %v451_v16, 0 }
 0x10f   : > { %v393_v27 = vpop.xlane.xlu1 %392 }
 0x110   : > { %v396_v28 = vsub.f32 %v390_v21, %v393_v27 }
 0x111   : > { %v430_v53 = vpop.xlane.xlu2 %429 }
 0x112   : > { %v398_v29 = vmul.f32 1.442695, %v396_v28 }
 0x114   : > { %901 = vpow2.f32 %v398_v29 }
 0x117   : > { %v395_v30 = vpop.xlane.xlu1 %394 }
 0x118   : > { %v397_v31 = vsub.f32 %v391_v26, %v395_v30 }
 0x11a   : > { %v902_v32 = vpop.eup %901  ;;  %v400_v33 = vmul.f32 1.442695, %v397_v31 }
 0x11b   : > { %402 = vadd.xlane.f32.xlu0 %v902_v32 }
 0x11c   : > { %903 = vpow2.f32 %v400_v33 }
 0x122   : > { %v904_v35 = vpop.eup %903 }
 0x123   : > { %404 = vadd.xlane.f32.xlu1 %v904_v35 }
 0x12b   : > { %431 = vadd.xlane.f32.xlu1 %v428_v37 }
 0x18e   : > { %v403_v44 = vpop.xlane.xlu0 %402 }
 0x18f   : > { %905 = vrcp.f32 %v403_v44 }
 0x190   : > { %907 = vlog2.f32 %v403_v44 }
 0x195   : > { %v906_v45 = vpop.eup %905 }
 0x196   : > { %v908_v46 = vpop.eup %907  ;;  %v408_v47 = vmul.f32 %v906_v45, %v902_v32  ;;  %v405_v48 = vpop.xlane.xlu1 %404 }
 0x197   : > { %v441_v49 = vmul.f32 0.6931472, %v908_v46  ;;  %909 = vrcp.f32 %v405_v48 }
 0x198   : > { %410 = vst [vmem:[%s1104_s17] sm:$0xff] %v408_v47  ;;  %911 = vlog2.f32 %v405_v48 }
 0x199   : > { %v444_v50 = vadd.f32 %v441_v49, %v393_v27 }
 0x19b   : > { %v446_v55 = vsub.f32 %v444_v50, %v430_v53 }
 0x19d   : > { %v910_v51 = vpop.eup %909  ;;  %v448_v60 = vmul.f32 %v780_v39, %v446_v55 }
 0x19e   : > { %v912_v52 = vpop.eup %911  ;;  %v409_v54 = vmul.f32 %v910_v51, %v904_v35  ;;  %v432_v58 = vpop.xlane.xlu1 %431 }
 0x19f   : > { %v443_v56 = vmul.f32 0.6931472, %v912_v52  ;;  %v454_v62 = vsel %vm453_vm9, %v448_v60, 0.0 }
 0x1a0   : > { %411 = vst [vmem:[%s1104_s17 + $0x8] sm:$0xff] %v409_v54 }
 0x1a1   : > { %v445_v57 = vadd.f32 %v443_v56, %v395_v30 }
 0x1a3   : > { %v447_v59 = vsub.f32 %v445_v57, %v432_v58 }
 0x1a5   : > { %v449_v61 = vmul.f32 %v781_v40, %v447_v59 }
 0x1a7   : > { %v455_v63 = vsel %vm453_vm9, %v449_v61, 0.0 }
 0x1a8   : > { %v456_v0 = vadd.f32 %v455_v63, %v454_v62 }
 0x1aa   : > { %457 = vadd.xlane.f32.xlu1 %v456_v0 }
 0x1b2   : > { %469 = vadd.xlane.f32.xlu1 %v468_v43 }
 0x21d   : > { %v458_v1 = vpop.xlane.xlu1 %457 }
 0x21e   : > { %v459_v2 = vrot.slane %v458_v1, 4 }
 0x220   : > { %v460_v3 = vadd.f32 %v459_v2, %v458_v1 }
 0x222   : > { %v461_v4 = vrot.slane %v460_v3, 2 }
 0x224   : > { %v462_v5 = vadd.f32 %v461_v4, %v460_v3 }
 0x225   : > { %v470_v6 = vpop.xlane.xlu1 %469 }
 0x226   : > { %v471_v7 = vrot.slane %v470_v6, 4  ;;  %v463_v8 = vrot.slane %v462_v5, 1 }
 0x228   : > { %v472_v9 = vadd.f32 %v471_v7, %v470_v6  ;;  %v464_v10 = vadd.f32 %v463_v8, %v462_v5 }
 0x22a   : > { %v473_v11 = vrot.slane %v472_v9, 2  ;;  %804 = vpush %v464_v10 }
 0x22c   : > { %v474_v13 = vadd.f32 %v473_v11, %v472_v9 }
 0x22e   : > { %v475_v14 = vrot.slane %v474_v13, 1 }
 0x230   : > { %v476_v15 = vadd.f32 %v475_v14, %v474_v13 }
 0x232   : > { %806 = vpush %v476_v15 }
 0x25b   : > { %s805_s19 = spop %804 }
 0x25c   : > { %v478_v17 = vstv %s805_s19 }
 0x262   : > { %492 = sbr.rel (!%p1071_p4) target bundleno = 654 (0x28e), region = 44 }
 0x263   : > { %s807_s23 = spop %806 }
 0x264   : > { %v479_v18 = vstv %s807_s23 }
 0x265   : > { %v480_v19 = vsel %vm452_vm10, %v478_v17, %v479_v18 }
 0x266   : > { %481 = vst [vmem:[%s329_s22] sm:$0xff] %v480_v19 }
 0x267   : > { %s1170_s24 = smov (!%p495_p10, %s494_s24), 2 }
 0x268   : > { %s784_s11 = sshll.u32 %s1170_s24, 3 }
 0x269   : > { %p787_p11 = scmp.eq.s32.totalorder %s784_s11, 0 }
 0x26a   : > { %s1129_s12 = sshrl.u32 (!%p787_p11), %s1170_s24, 1 }
 0x26b   : > { %503 = sbr.rel (%p787_p11) target bundleno = 654 (0x28e), region = 48  ;;  %p788_p12 = scmp.le.s32.totalorder (!%p787_p11), %s1129_s12, 0 }
 0x270   : > { %692 = sbr.rel (%p788_p12) target bundleno = 637 (0x27d), region = 142  ;;  %s969_s0 = smov (!%p788_p12), %s1123_s8  }
 0x271   : > { %s973_s10 = smov (!%p788_p12), %s1104_s17   ;;  %s977_s13 = smov (!%p788_p12), 0  }
 0x272   : > { %s981_s14 = smov (!%p788_p12), 0  }
 0x275 LB: >> { %v568_v12 = vld [vmem:[%s975_s10] sm:$0xff]  ;;  %v570_v20 = vld [vmem:[%s975_s10 + $0x8] sm:$0xff]  ;;  %s572_s15 = sadd.s32 1, %s979_s13  ;;  %s562_s14 = sadd.s32 1, %s983_s14   ;;  %s983_s14 = sphi %s981_s14, %s562_s14   ;;  %s979_s13 = sphi %s977_s13, %s978_s13   ;;  %s975_s10 = sphi %s973_s10, %s577_s10   ;;  %s971_s0 = sphi %s969_s0, %s578_s0  }
 0x276   : >> { %569 = vst [vmem:[%s971_s0] sm:$0xff] %v568_v12  ;;  %p573_p13 = scmp.ge.s32.totalorder %s572_s15, %s1129_s12  ;;  %p561_p0 = scmp.ge.s32.totalorder %s562_s14, %s1129_s12 }
 0x277   : >> { %571 = vst [vmem:[%s971_s0 + $0x8] sm:$0xff] %v570_v20 }
 0x278   : >> { %s1172_s15 = smov (%p573_p13, %s572_s15), 0  ;;  %564 = sbr.rel (!%p561_p0) target bundleno = 629 (0x275), region = 148 }
 0x279   : >> { %s789_s16 = sshll.u32 %s1172_s15, 4  ;;  %s978_s13 = smov %s1172_s15  }
 0x27a   : >> { %s577_s10 = scalar_lea.vmem %s1104_s17, %s789_s16 [#allocation4]   ;;  %s578_s0 = scalar_lea.vmem %s1123_s8, %s789_s16  }
 0x27d PF: > { %s1139_s26 = sand.u32 1, %s1170_s24   ;;  %s802_s18 = sshll.u32 %s1129_s12, 4 }
 0x27e   : > { %s583_s19 = scalar_lea.vmem %s1104_s17, %s802_s18 [#allocation4]   ;;  %s585_s20 = scalar_lea.vmem %s1123_s8, %s802_s18  }
 0x27f   : > { %p794_p1 = scmp.le.s32.totalorder %s1139_s26, 0 }
 0x280   : > { %s985_s21 = smov (!%p794_p1), %s585_s20   ;;  %s989_s22 = smov (!%p794_p1), %s583_s19  }
 0x281   : > { %706 = sbr.rel (%p794_p1) target bundleno = 654 (0x28e), region = 153  ;;  %s993_s23 = smov (!%p794_p1), 0  }
 0x282   : > { %s997_s25 = smov (!%p794_p1), 0  }
 0x286 LB: >> { %v595_v21 = vld [vmem:[%s991_s22] sm:$0xff]  ;;  %s597_s24 = sadd.s32 1, %s995_s23  ;;  %s589_s25 = sadd.s32 1, %s999_s25   ;;  %s999_s25 = sphi %s997_s25, %s589_s25   ;;  %s995_s23 = sphi %s993_s23, %s994_s23   ;;  %s991_s22 = sphi %s989_s22, %s602_s22   ;;  %s987_s21 = sphi %s985_s21, %s603_s21  }
 0x287   : >> { %596 = vst [vmem:[%s987_s21] sm:$0xff] %v595_v21  ;;  %p598_p2 = scmp.ge.s32.totalorder %s597_s24, %s1139_s26  ;;  %p588_p3 = scmp.ge.s32.totalorder %s589_s25, %s1139_s26 }
 0x289   : >> { %s1174_s24 = smov (%p598_p2, %s597_s24), 0  ;;  %591 = sbr.rel (!%p588_p3) target bundleno = 646 (0x286), region = 159 }
 0x28a   : >> { %s795_s17 = sshll.u32 %s1174_s24, 3  ;;  %s994_s23 = smov %s1174_s24  }
 0x28b   : >> { %s602_s22 = scalar_lea.vmem %s583_s19, %s795_s17 [#allocation4]   ;;  %s603_s21 = scalar_lea.vmem %s585_s20, %s795_s17  }
 0x28e PF: > { %p16_p4 = scmp.ge.s32.totalorder %s1061_s29, 4   ;;  %s1166_s26 = smov %s963_s27 }
 0x28f   : > { %s1167_s27 = smov %s1069_s9  ;;  %s1168_s28 = smov %s1061_s29 }
 0x290   :  { %18 = sbr.rel (!%p16_p4) target bundleno = 4 (0x4), region = 170 }

</bundles_post_ra>
